<compile_context>
chip_gen: v7x
topology: tpu7x:2x2x1
jax: 0.10.0
libtpu: 0.0.40
codegen_flags: <defaults>
</compile_context>

<pallas_src>
import math

import jax
import jax.numpy as jnp
from jax.experimental import pallas as pl
from jax.experimental.pallas import tpu as pltpu


def mlp_kernel(x_ref, w1_ref, b1_ref, w23_ref, b23_ref, w4_ref, b4_ref, o_ref):
    x = x_ref[...]                                                     # [TB, 136]
    h = jnp.dot(x, w1_ref[...], preferred_element_type=jnp.float32)    # [TB, 256]
    h = jnp.maximum(h + b1_ref[...], 0.0)                              # ReLU
    h = jnp.dot(h, w23_ref[...], preferred_element_type=jnp.float32)   # [TB, 64] (fused 256->128->64)
    h = jnp.maximum(h + b23_ref[...], 0.0)                             # ReLU
    # TODO(synk): final [TB,64]x[64,2] uses <1% of MXU columns and a masked
    # 2-lane store; absolute cost is negligible so it is left as-is.
    o = jnp.dot(h, w4_ref[...], preferred_element_type=jnp.float32)    # [TB, 2]
    o_ref[...] = o + b4_ref[...]


def _round_up(x, m):
    return (x + m - 1) // m * m


def eye_tracking_forward(landmarks, params, *, tb=256):
    (w1, b1), (w2, b2), (w3, b3), (w4, b4) = params
    # Fuse the two activation-free layers (256->128->64) into one 256->64 GEMM.
    w23 = (w2 @ w3).astype(jnp.float32)          # [256, 64]
    b23 = (b2 @ w3 + b3).astype(jnp.float32)     # [1, 64]

    B, F = landmarks.shape
    tb = min(tb, _round_up(B, 8))                # batch tile, multiple of 8
    Bp = _round_up(B, tb)
    x = landmarks
    if Bp != B:
        x = jnp.pad(x, ((0, Bp - B), (0, 0)))
    grid = (Bp // tb,)

    def const(shape):
        # Constant index map: block never changes -> fetched once, VMEM-resident.
        return pl.BlockSpec(shape, lambda i: (0, 0))

    flops = 2 * Bp * (136 * 256 + 256 * 64 + 64 * 2)
    bytes_accessed = 4 * (
        Bp * (136 + 2)
        + w1.size + b1.size + w23.size + b23.size + w4.size + b4.size
    )

    out = pl.pallas_call(
        mlp_kernel,
        out_shape=jax.ShapeDtypeStruct((Bp, 2), jnp.float32),
        grid=grid,
        in_specs=[
            pl.BlockSpec((tb, F), lambda i: (i, 0)),   # pipelined landmarks tile
            const(w1.shape), const(b1.shape),
            const(w23.shape), const(b23.shape),
            const(w4.shape), const(b4.shape),
        ],
        out_specs=pl.BlockSpec((tb, 2), lambda i: (i, 0)),
        compiler_params=pltpu.CompilerParams(
            dimension_semantics=("parallel",)),        # shard batch across v7x TCs
        cost_estimate=pl.CostEstimate(
            flops=flops, transcendentals=0, bytes_accessed=bytes_accessed),
    )(x, w1, b1, w23, b23, w4, b4)
    return out[:B]


def init_linear(key, fan_in, fan_out):
    # PyTorch nn.Linear default init: U(-1/sqrt(fan_in), 1/sqrt(fan_in)).
    kw, kb = jax.random.split(key)
    bound = 1.0 / math.sqrt(fan_in)
    w = jax.random.uniform(kw, (fan_in, fan_out), jnp.float32, -bound, bound)
    b = jax.random.uniform(kb, (1, fan_out), jnp.float32, -bound, bound)
    return w, b


def reference_forward(landmarks, params):
    # Original (unfused) 4-layer forward, matching the PyTorch module.
    (w1, b1), (w2, b2), (w3, b3), (w4, b4) = params
    h = jnp.maximum(landmarks @ w1 + b1, 0.0)   # Linear(136,256) + ReLU
    h = h @ w2 + b2                             # Linear(256,128)
    h = jnp.maximum(h @ w3 + b3, 0.0)           # Linear(128,64) + ReLU
    return h @ w4 + b4                          # Linear(64,2)


if __name__ == "__main__":
    key = jax.random.PRNGKey(0)
    k_in, k1, k2, k3, k4 = jax.random.split(key, 5)

    # Small, non-tile-aligned batch to exercise the batch grid + padding path.
    B = 300
    landmarks = jax.random.normal(k_in, (B, 136), jnp.float32)

    params = (
        init_linear(k1, 136, 256),
        init_linear(k2, 256, 128),
        init_linear(k3, 128, 64),
        init_linear(k4, 64, 2),
    )

    out = eye_tracking_forward(landmarks, params, tb=128)  # grid of 3 tiles
    out = jax.block_until_ready(out)

    ref = reference_forward(landmarks, params)
    assert out.shape == (B, 2)
    assert jnp.allclose(out, ref, atol=1e-3, rtol=1e-3)

    print("KERNEL_OK")
</pallas_src>

<mosaic_0001>
module attributes {stable_mosaic.version = 11 : i64} {
  func.func @mlp_kernel(%arg0: i32, %arg1: memref<128x136xf32, #tpu.memory_space<vmem>>, %arg2: memref<136x256xf32, #tpu.memory_space<vmem>>, %arg3: memref<1x256xf32, #tpu.memory_space<vmem>>, %arg4: memref<256x64xf32, #tpu.memory_space<vmem>>, %arg5: memref<1x64xf32, #tpu.memory_space<vmem>>, %arg6: memref<64x2xf32, #tpu.memory_space<vmem>>, %arg7: memref<1x2xf32, #tpu.memory_space<vmem>>, %arg8: memref<128x2xf32, #tpu.memory_space<vmem>>) attributes {dimension_semantics = [#tpu.dimension_semantics<parallel>], iteration_bounds = array<i64: 3>, scalar_prefetch = 0 : i64, scratch_operands = 0 : i64, tpu.core_type = #tpu.core_type<tc>, window_params = [{transform_indices = @transform_0, window_bounds = array<i64: 128, 136>}, {pipeline_mode = #tpu.pipeline_mode<synchronous>, transform_indices = @transform_1, window_bounds = array<i64: 136, 256>}, {pipeline_mode = #tpu.pipeline_mode<synchronous>, transform_indices = @transform_2, window_bounds = array<i64: 1, 256>}, {pipeline_mode = #tpu.pipeline_mode<synchronous>, transform_indices = @transform_3, window_bounds = array<i64: 256, 64>}, {pipeline_mode = #tpu.pipeline_mode<synchronous>, transform_indices = @transform_4, window_bounds = array<i64: 1, 64>}, {pipeline_mode = #tpu.pipeline_mode<synchronous>, transform_indices = @transform_5, window_bounds = array<i64: 64, 2>}, {pipeline_mode = #tpu.pipeline_mode<synchronous>, transform_indices = @transform_6, window_bounds = array<i64: 1, 2>}, {transform_indices = @transform_7, window_bounds = array<i64: 128, 2>}]} {
    %c0 = arith.constant 0 : index
    %c0_0 = arith.constant 0 : index
    %0 = vector.load %arg1[%c0, %c0_0] : memref<128x136xf32, #tpu.memory_space<vmem>>, vector<128x136xf32>
    %c0_1 = arith.constant 0 : index
    %c0_2 = arith.constant 0 : index
    %1 = vector.load %arg2[%c0_1, %c0_2] : memref<136x256xf32, #tpu.memory_space<vmem>>, vector<136x256xf32>
    %cst = arith.constant dense<0.000000e+00> : vector<128x256xf32>
    %2 = tpu.matmul %0, %1, %cst {dimension_numbers = #tpu.dot_dimension_numbers<[1], [0], [0], [1], [0, 0, 1, 1], [], []>} : vector<128x136xf32>, vector<136x256xf32>, vector<128x256xf32> -> vector<128x256xf32>
    %c0_3 = arith.constant 0 : index
    %c0_4 = arith.constant 0 : index
    %3 = vector.load %arg3[%c0_3, %c0_4] : memref<1x256xf32, #tpu.memory_space<vmem>>, vector<1x256xf32>
    %4 = vector.broadcast %3 : vector<1x256xf32> to vector<128x256xf32>
    %5 = arith.addf %2, %4 : vector<128x256xf32>
    %cst_5 = arith.constant 0.000000e+00 : f32
    %6 = vector.broadcast %cst_5 : f32 to vector<128x256xf32>
    %7 = arith.maximumf %5, %6 : vector<128x256xf32>
    %c0_6 = arith.constant 0 : index
    %c0_7 = arith.constant 0 : index
    %8 = vector.load %arg4[%c0_6, %c0_7] : memref<256x64xf32, #tpu.memory_space<vmem>>, vector<256x64xf32>
    %cst_8 = arith.constant dense<0.000000e+00> : vector<128x64xf32>
    %9 = tpu.matmul %7, %8, %cst_8 {dimension_numbers = #tpu.dot_dimension_numbers<[1], [0], [0], [1], [0, 0, 1, 1], [], []>} : vector<128x256xf32>, vector<256x64xf32>, vector<128x64xf32> -> vector<128x64xf32>
    %c0_9 = arith.constant 0 : index
    %c0_10 = arith.constant 0 : index
    %10 = vector.load %arg5[%c0_9, %c0_10] : memref<1x64xf32, #tpu.memory_space<vmem>>, vector<1x64xf32>
    %11 = vector.broadcast %10 : vector<1x64xf32> to vector<128x64xf32>
    %12 = arith.addf %9, %11 : vector<128x64xf32>
    %cst_11 = arith.constant 0.000000e+00 : f32
    %13 = vector.broadcast %cst_11 : f32 to vector<128x64xf32>
    %14 = arith.maximumf %12, %13 : vector<128x64xf32>
    %c0_12 = arith.constant 0 : index
    %c0_13 = arith.constant 0 : index
    %15 = vector.load %arg6[%c0_12, %c0_13] : memref<64x2xf32, #tpu.memory_space<vmem>>, vector<64x2xf32>
    %cst_14 = arith.constant dense<0.000000e+00> : vector<128x2xf32>
    %16 = tpu.matmul %14, %15, %cst_14 {dimension_numbers = #tpu.dot_dimension_numbers<[1], [0], [0], [1], [0, 0, 1, 1], [], []>} : vector<128x64xf32>, vector<64x2xf32>, vector<128x2xf32> -> vector<128x2xf32>
    %c0_15 = arith.constant 0 : index
    %c0_16 = arith.constant 0 : index
    %17 = vector.load %arg7[%c0_15, %c0_16] : memref<1x2xf32, #tpu.memory_space<vmem>>, vector<1x2xf32>
    %18 = vector.broadcast %17 : vector<1x2xf32> to vector<128x2xf32>
    %19 = arith.addf %16, %18 : vector<128x2xf32>
    %c0_17 = arith.constant 0 : index
    %c0_18 = arith.constant 0 : index
    %20 = vector.load %arg8[%c0_17, %c0_18] : memref<128x2xf32, #tpu.memory_space<vmem>>, vector<128x2xf32>
    tpu.vector_store %arg8[%c0_17, %c0_18], %19 {strides = array<i32>} : memref<128x2xf32, #tpu.memory_space<vmem>>, vector<128x2xf32>,
    return
  }
  func.func @transform_0(%arg0: i32) -> (i32, i32) {
    %c0_i32 = arith.constant 0 : i32
    %c0_i32_0 = arith.constant 0 : i32
    return %arg0, %c0_i32 : i32, i32
  }
  func.func @transform_1(%arg0: i32) -> (i32, i32) {
    %c0_i32 = arith.constant 0 : i32
    %c0_i32_0 = arith.constant 0 : i32
    %c0_i32_1 = arith.constant 0 : i32
    return %c0_i32, %c0_i32_0 : i32, i32
  }
  func.func @transform_2(%arg0: i32) -> (i32, i32) {
    %c0_i32 = arith.constant 0 : i32
    %c0_i32_0 = arith.constant 0 : i32
    %c0_i32_1 = arith.constant 0 : i32
    return %c0_i32, %c0_i32_0 : i32, i32
  }
  func.func @transform_3(%arg0: i32) -> (i32, i32) {
    %c0_i32 = arith.constant 0 : i32
    %c0_i32_0 = arith.constant 0 : i32
    %c0_i32_1 = arith.constant 0 : i32
    return %c0_i32, %c0_i32_0 : i32, i32
  }
  func.func @transform_4(%arg0: i32) -> (i32, i32) {
    %c0_i32 = arith.constant 0 : i32
    %c0_i32_0 = arith.constant 0 : i32
    %c0_i32_1 = arith.constant 0 : i32
    return %c0_i32, %c0_i32_0 : i32, i32
  }
  func.func @transform_5(%arg0: i32) -> (i32, i32) {
    %c0_i32 = arith.constant 0 : i32
    %c0_i32_0 = arith.constant 0 : i32
    %c0_i32_1 = arith.constant 0 : i32
    return %c0_i32, %c0_i32_0 : i32, i32
  }
  func.func @transform_6(%arg0: i32) -> (i32, i32) {
    %c0_i32 = arith.constant 0 : i32
    %c0_i32_0 = arith.constant 0 : i32
    %c0_i32_1 = arith.constant 0 : i32
    return %c0_i32, %c0_i32_0 : i32, i32
  }
  func.func @transform_7(%arg0: i32) -> (i32, i32) {
    %c0_i32 = arith.constant 0 : i32
    %c0_i32_0 = arith.constant 0 : i32
    return %arg0, %c0_i32 : i32, i32
  }
}

</mosaic_0001>

<bundles_post_ra>
// kernel: tpu_custom_call.1
= control target key start
LH: loop header
LB: loop body
LE: loop exit
PB: predicated region body
PF: predicated region fallthrough
CT: control target
= control target key end

     0   :  { %s1430_s24 = smov 0   ;;  %s1836_s0 = inlined_call_operand.vmem [shape: f32[384,136], index: 0, kind: input, shape index: {}]   ;;  %s1837_s1 = inlined_call_operand.vmem [shape: f32[136,256], index: 1, kind: input, shape index: {}]   ;;  %s1838_s2 = inlined_call_operand.vmem [shape: f32[1,256], index: 2, kind: input, shape index: {}]   ;;  %s1839_s3 = inlined_call_operand.vmem [shape: f32[256,64], index: 3, kind: input, shape index: {}]   ;;  %s1840_s4 = inlined_call_operand.vmem [shape: f32[1,64], index: 4, kind: input, shape index: {}]   ;;  %s1841_s5 = inlined_call_operand.vmem [shape: f32[64,2], index: 5, kind: input, shape index: {}]   ;;  %s1842_s6 = inlined_call_operand.vmem [shape: f32[1,2], index: 6, kind: input, shape index: {}]   ;;  %s1843_s7 = inlined_call_operand.vmem [shape: f32[384,2], index: 7, kind: output, shape index: {}]  }
   0x1 LB: > { %s1087_s25 = sadd.s32 4294967295, %s1388_s24   ;;  %p1091_p0 = scmp.ge.s32.totalorder %s1388_s24, 1  ;;  %s1388_s24 = sphi %s1430_s24, %s17_s24  }
   0x2   : > { %p239_p1 = scmp.lt.s32.totalorder %s1388_s24, 4 }
   0x4   : > { %p240_p2 = pnand %p1091_p0, %p239_p1 }
   0x5   : > { %v318_v0 = vld [vmem:[%s1837_s1 + $0x8] sm:$0xff] (!%p240_p2)  ;;  %v320_v1 = vld [vmem:[%s1837_s1 + $0x18] sm:$0xff] (!%p240_p2)  ;;  %v317_v2 = vld [vmem:[%s1837_s1] sm:$0xff] (!%p240_p2)  ;;  %s1092_s9 = sshll.u32 (!%p240_p2), %s1087_s25, 4  ;;  %vm363_vm0 = vcmask (!%p240_p2), 64512   ;;  %vm820_vm1 = vcmask (!%p240_p2), 523264  }
   0x6   : > { %243 = sbr.rel (%p240_p2) target bundleno = 755 (0x2f3), region = 48  ;;  %v1278_v3 = vpack.c.bf16 (!%p240_p2), %v320_v1, %v318_v0  ;;  %v319_v4 = vld [vmem:[%s1837_s1 + $0x10] sm:$0xff] (!%p240_p2)  ;;  %v322_v5 = vld [vmem:[%s1837_s1 + $0x28] sm:$0xff] (!%p240_p2)  ;;  %v324_v6 = vld [vmem:[%s1837_s1 + $0x38] sm:$0xff] (!%p240_p2)  ;;  %p273_p3 = scmp.lt.s32.totalorder (!%p240_p2), %s1092_s9, 47  ;;  %vm1014_vm2 = vcmask (!%p240_p2), 15360  }
   0x7   : > { %v1280_v7 = vpack.c.bf16 (!%p240_p2), %v319_v4, %v317_v2  ;;  %v1282_v8 = vpack.c.bf16 (!%p240_p2), %v324_v6, %v322_v5  ;;  %v321_v9 = vld [vmem:[%s1837_s1 + $0x20] sm:$0xff] (!%p240_p2)  ;;  %v323_v10 = vld [vmem:[%s1837_s1 + $0x30] sm:$0xff] (!%p240_p2)  ;;  %v326_v11 = vld [vmem:[%s1837_s1 + $0x48] sm:$0xff] (!%p240_p2) }
   0x8   : > { %1279 = vmatprep.subr.bf16.mxu0 (!%p240_p2), %v1278_v3  ;;  %v328_v12 = vld [vmem:[%s1837_s1 + $0x58] sm:$0xff] (!%p240_p2)  ;;  %v1284_v13 = vpack.c.bf16 (!%p240_p2), %v323_v10, %v321_v9  ;;  %v325_v15 = vld [vmem:[%s1837_s1 + $0x40] sm:$0xff] (!%p240_p2)  ;;  %v327_v16 = vld [vmem:[%s1837_s1 + $0x50] sm:$0xff] (!%p240_p2) }
   0x9   : > { %1281 = vmatpush1.bf16.msra.mxu0 (!%p240_p2), %v1280_v7  ;;  %v1286_v14 = vpack.c.bf16 (!%p240_p2), %v328_v12, %v326_v11  ;;  %v330_v17 = vld [vmem:[%s1837_s1 + $0x68] sm:$0xff] (!%p240_p2)  ;;  %v332_v18 = vld [vmem:[%s1837_s1 + $0x78] sm:$0xff] (!%p240_p2)  ;;  %v1288_v19 = vpack.c.bf16 (!%p240_p2), %v327_v16, %v325_v15  ;;  %v329_v21 = vld [vmem:[%s1837_s1 + $0x60] sm:$0xff] (!%p240_p2) }
   0xa   : > { %1283 = vmatprep.subr.bf16.mxu0 (!%p240_p2), %v1282_v8  ;;  %v1290_v20 = vpack.c.bf16 (!%p240_p2), %v332_v18, %v330_v17  ;;  %v331_v22 = vld [vmem:[%s1837_s1 + $0x70] sm:$0xff] (!%p240_p2)  ;;  %v334_v23 = vld [vmem:[%s1837_s1 + $0x88] sm:$0xff] (!%p240_p2)  ;;  %v336_v24 = vld [vmem:[%s1837_s1 + $0x98] sm:$0xff] (!%p240_p2) }
   0xb   : > { %v1292_v26 = vpack.c.bf16 (!%p240_p2), %v331_v22, %v329_v21  ;;  %v1294_v27 = vpack.c.bf16 (!%p240_p2), %v336_v24, %v334_v23  ;;  %v333_v28 = vld [vmem:[%s1837_s1 + $0x80] sm:$0xff] (!%p240_p2)  ;;  %v335_v29 = vld [vmem:[%s1837_s1 + $0x90] sm:$0xff] (!%p240_p2)  ;;  %v338_v30 = vld [vmem:[%s1837_s1 + $0xa8] sm:$0xff] (!%p240_p2) }
   0xc   : > { %v340_v31 = vld [vmem:[%s1837_s1 + $0xb8] sm:$0xff] (!%p240_p2)  ;;  %v1296_v32 = vpack.c.bf16 (!%p240_p2), %v335_v29, %v333_v28  ;;  %v337_v34 = vld [vmem:[%s1837_s1 + $0xa0] sm:$0xff] (!%p240_p2)  ;;  %v339_v35 = vld [vmem:[%s1837_s1 + $0xb0] sm:$0xff] (!%p240_p2) }
   0xd   : > { %s1845_s9 = smov (!%p273_p3, %s1092_s9), 47  ;;  %1285 = vmatpush1.bf16.msra.mxu0 %v1284_v13  ;;  %v1298_v33 = vpack.c.bf16 %v340_v31, %v338_v30  ;;  %v342_v36 = vld [vmem:[%s1837_s1 + $0xc8] sm:$0xff]  ;;  %v344_v37 = vld [vmem:[%s1837_s1 + $0xd8] sm:$0xff]  ;;  %v1300_v38 = vpack.c.bf16 %v339_v35, %v337_v34  ;;  %v341_v39 = vld [vmem:[%s1837_s1 + $0xc0] sm:$0xff] }
   0xe   : > { %s1133_s29 = sshll.u32 %s1845_s9, 4  ;;  %1287 = vmatprep.subr.bf16.mxu0 %v1286_v14  ;;  %v1302_v40 = vpack.c.bf16 %v344_v37, %v342_v36  ;;  %v343_v41 = vld [vmem:[%s1837_s1 + $0xd0] sm:$0xff]  ;;  %v346_v42 = vld [vmem:[%s1837_s1 + $0xe8] sm:$0xff]  ;;  %v348_v43 = vld [vmem:[%s1837_s1 + $0xf8] sm:$0xff]  ;;  %s1096_s17 = sshll.u32 %s1845_s9, 3 }
   0xf   : > { %s1486_s14 = scalar_lea.vmem %s1836_s0, %s1133_s29  ;;  %v621_v44 = vld [vmem:[%s1839_s3 + $0x80] sm:$0xff]  ;;  %v622_v45 = vld [vmem:[%s1839_s3 + $0x88] sm:$0xff]  ;;  %v623_v49 = vld [vmem:[%s1839_s3 + $0x90] sm:$0xff]  ;;  %v1304_v51 = vpack.c.bf16 %v343_v41, %v341_v39  ;;  %v1306_v54 = vpack.c.bf16 %v348_v43, %v346_v42  ;;  %s1799_s22 = scalar_lea.vmem %s1843_s7, %s1096_s17 }
  0x10   : > { %v286_v25 = vld [vmem:[%s1486_s14 + $0x8] sm:$0xff]  ;;  %v605_v46 = vld [vmem:[%s1839_s3] sm:$0xff]  ;;  %v1310_v47 = vpack.c.bf16 %v622_v45, %v621_v44  ;;  %v624_v50 = vld [vmem:[%s1839_s3 + $0x98] sm:$0xff] }
  0x11   : > { %1289 = vmatpush1.bf16.msra.mxu0 %v1288_v19  ;;  %1097 = vmatprep.mubr.msk.f32.mxu0 %vm363_vm0, %v286_v25  ;;  %v606_v48 = vld [vmem:[%s1839_s3 + $0x8] sm:$0xff]  ;;  %v345_v52 = vld [vmem:[%s1837_s1 + $0xe0] sm:$0xff]  ;;  %v347_v55 = vld [vmem:[%s1837_s1 + $0xf0] sm:$0xff]  ;;  %v1314_v56 = vpack.c.bf16 %v624_v50, %v623_v49 }
  0x12   : > { %1291 = vmatprep.subr.bf16.mxu0 %v1290_v20  ;;  %v1312_v53 = vpack.c.bf16 %v606_v48, %v605_v46  ;;  %v607_v57 = vld [vmem:[%s1839_s3 + $0x10] sm:$0xff]  ;;  %v608_v58 = vld [vmem:[%s1839_s3 + $0x18] sm:$0xff]  ;;  %1358 = vmatprep.subr.bf16.mxu1 %v1310_v47  ;;  %v625_v59 = vld [vmem:[%s1839_s3 + $0xa0] sm:$0xff]  ;;  %v1308_v61 = vpack.c.bf16 %v347_v55, %v345_v52 }
  0x13   : > { %v626_v60 = vld [vmem:[%s1839_s3 + $0xa8] sm:$0xff]  ;;  %v1316_v62 = vpack.c.bf16 %v608_v58, %v607_v57  ;;  %v609_v0 = vld [vmem:[%s1839_s3 + $0x20] sm:$0xff]  ;;  %v627_v3 = vld [vmem:[%s1839_s3 + $0xb0] sm:$0xff] }
  0x14   : > { %1366 = vmatpush3.bf16.msra.mxu1 %v1312_v53  ;;  %v1318_v63 = vpack.c.bf16 %v626_v60, %v625_v59  ;;  %v610_v1 = vld [vmem:[%s1839_s3 + $0x28] sm:$0xff]  ;;  %v628_v4 = vld [vmem:[%s1839_s3 + $0xb8] sm:$0xff]  ;;  %v349_v6 = vld [vmem:[%s1837_s1 + $0x100] sm:$0xff] }
  0x15   : > { %1293 = vmatpush1.bf16.msra.mxu0 %v1292_v26  ;;  %1359 = vmatprep.subr.bf16.mxu1 %v1314_v56  ;;  %v350_v2 = vld [vmem:[%s1837_s1 + $0x108] sm:$0xff]  ;;  %v1320_v5 = vpack.c.bf16 %v610_v1, %v609_v0  ;;  %v1322_v7 = vpack.c.bf16 %v628_v4, %v627_v3  ;;  %v285_v8 = vld [vmem:[%s1486_s14] sm:$0xff]  ;;  %v611_v9 = vld [vmem:[%s1839_s3 + $0x30] sm:$0xff] }
  0x16   : > { %1295 = vmatprep.subr.bf16.mxu0 %v1294_v27  ;;  %v612_v10 = vld [vmem:[%s1839_s3 + $0x38] sm:$0xff]  ;;  %v629_v12 = vld [vmem:[%s1839_s3 + $0xc0] sm:$0xff]  ;;  %v630_v13 = vld [vmem:[%s1839_s3 + $0xc8] sm:$0xff] }
  0x17   : > { %v288_v11 = vld [vmem:[%s1486_s14 + $0x18] sm:$0xff]  ;;  %v1324_v14 = vpack.c.bf16 %v612_v10, %v611_v9  ;;  %v287_v15 = vld [vmem:[%s1486_s14 + $0x10] sm:$0xff]  ;;  %v1326_v16 = vpack.c.bf16 %v630_v13, %v629_v12  ;;  %v613_v17 = vld [vmem:[%s1839_s3 + $0x40] sm:$0xff] }
  0x18   : > { %1367 = vmatpush3.bf16.msra.mxu1 %v1316_v62  ;;  %v614_v18 = vld [vmem:[%s1839_s3 + $0x48] sm:$0xff]  ;;  %v631_v20 = vld [vmem:[%s1839_s3 + $0xd0] sm:$0xff]  ;;  %v632_v21 = vld [vmem:[%s1839_s3 + $0xd8] sm:$0xff] }
  0x19   : > { %1297 = vmatpush1.bf16.msra.mxu0 %v1296_v32  ;;  %1360 = vmatprep.subr.bf16.mxu1 %v1318_v63  ;;  %v290_v19 = vld [vmem:[%s1486_s14 + $0x28] sm:$0xff]  ;;  %v1328_v22 = vpack.c.bf16 %v614_v18, %v613_v17  ;;  %v289_v23 = vld [vmem:[%s1486_s14 + $0x20] sm:$0xff]  ;;  %v1330_v24 = vpack.c.bf16 %v632_v21, %v631_v20  ;;  %v615_v25 = vld [vmem:[%s1839_s3 + $0x50] sm:$0xff] }
  0x1a   : > { %1299 = vmatprep.subr.bf16.mxu0 %v1298_v33  ;;  %v616_v26 = vld [vmem:[%s1839_s3 + $0x58] sm:$0xff]  ;;  %v633_v28 = vld [vmem:[%s1839_s3 + $0xe0] sm:$0xff]  ;;  %v634_v29 = vld [vmem:[%s1839_s3 + $0xe8] sm:$0xff] }
  0x1b   : > { %v292_v27 = vld [vmem:[%s1486_s14 + $0x38] sm:$0xff]  ;;  %v1332_v30 = vpack.c.bf16 %v616_v26, %v615_v25  ;;  %v291_v31 = vld [vmem:[%s1486_s14 + $0x30] sm:$0xff]  ;;  %v1334_v32 = vpack.c.bf16 %v634_v29, %v633_v28  ;;  %v294_v33 = vld [vmem:[%s1486_s14 + $0x48] sm:$0xff] }
  0x1c   : > { %1368 = vmatpush3.bf16.msra.mxu1 %v1320_v5  ;;  %v293_v34 = vld [vmem:[%s1486_s14 + $0x40] sm:$0xff]  ;;  %v296_v35 = vld [vmem:[%s1486_s14 + $0x58] sm:$0xff]  ;;  %v295_v36 = vld [vmem:[%s1486_s14 + $0x50] sm:$0xff] }
  0x1d   : > { %1301 = vmatpush1.bf16.msra.mxu0 %v1300_v38  ;;  %1361 = vmatprep.subr.bf16.mxu1 %v1322_v7  ;;  %v298_v37 = vld [vmem:[%s1486_s14 + $0x68] sm:$0xff]  ;;  %v297_v38 = vld [vmem:[%s1486_s14 + $0x60] sm:$0xff]  ;;  %v300_v39 = vld [vmem:[%s1486_s14 + $0x78] sm:$0xff] }
  0x1e   : > { %1303 = vmatprep.subr.bf16.mxu0 %v1302_v40  ;;  %v299_v40 = vld [vmem:[%s1486_s14 + $0x70] sm:$0xff]  ;;  %v302_v41 = vld [vmem:[%s1486_s14 + $0x88] sm:$0xff]  ;;  %v301_v42 = vld [vmem:[%s1486_s14 + $0x80] sm:$0xff] }
  0x1f   : > { %v304_v43 = vld [vmem:[%s1486_s14 + $0x98] sm:$0xff]  ;;  %v303_v44 = vld [vmem:[%s1486_s14 + $0x90] sm:$0xff]  ;;  %v306_v45 = vld [vmem:[%s1486_s14 + $0xa8] sm:$0xff] }
  0x20   : > { %1369 = vmatpush3.bf16.msra.mxu1 %v1324_v14  ;;  %v305_v46 = vld [vmem:[%s1486_s14 + $0xa0] sm:$0xff]  ;;  %v307_v48 = vld [vmem:[%s1486_s14 + $0xb0] sm:$0xff]  ;;  %v310_v49 = vld [vmem:[%s1486_s14 + $0xc8] sm:$0xff] }
  0x21   : > { %1305 = vmatpush1.bf16.msra.mxu0 %v1304_v51  ;;  %1362 = vmatprep.subr.bf16.mxu1 %v1326_v16  ;;  %v309_v50 = vld [vmem:[%s1486_s14 + $0xc0] sm:$0xff]  ;;  %v312_v51 = vld [vmem:[%s1486_s14 + $0xd8] sm:$0xff]  ;;  %v311_v52 = vld [vmem:[%s1486_s14 + $0xd0] sm:$0xff] }
  0x22   : > { %1307 = vmatprep.subr.bf16.mxu0 %v1306_v54  ;;  %v313_v54 = vld [vmem:[%s1486_s14 + $0xe0] sm:$0xff]  ;;  %v316_v55 = vld [vmem:[%s1486_s14 + $0xf8] sm:$0xff]  ;;  %v618_v58 = vld [vmem:[%s1839_s3 + $0x68] sm:$0xff] }
  0x23   : > { %v617_v57 = vld [vmem:[%s1839_s3 + $0x60] sm:$0xff]  ;;  %v635_v60 = vld [vmem:[%s1839_s3 + $0xf0] sm:$0xff]  ;;  %v620_v0 = vld [vmem:[%s1839_s3 + $0x78] sm:$0xff] }
  0x24   : > { %1370 = vmatpush3.bf16.msra.mxu1 %v1328_v22  ;;  %v1336_v59 = vpack.c.bf16 %v618_v58, %v617_v57  ;;  %v806_v3 = vld [vmem:[%s1841_s5 + $0x8] sm:$0xff] }
  0x25   : > { %1309 = vmatpush1.bf16.msra.mxu0 %v1308_v61  ;;  %1363 = vmatprep.subr.bf16.mxu1 %v1330_v24  ;;  %v636_v61 = vld [vmem:[%s1839_s3 + $0xf8] sm:$0xff] }
  0x26   : > { %444 = vmatprep.subr.mxu0 %v350_v2  ;;  %v805_v2 = vld [vmem:[%s1841_s5] sm:$0xff] }
  0x27   : > { %v1342_v4 = vpack.c.bf16 %v806_v3, %v805_v2 }
  0x28   : > { %1371 = vmatpush3.bf16.msra.mxu1 %v1332_v30 }
  0x29   : > { %445 = vmatpush1.msra.mxu0 %v349_v6  ;;  %1364 = vmatprep.subr.bf16.mxu1 %v1334_v32 }
  0x2a   : > { %477 = vmatmul.mubr.f32.vlgmr.msra.gmra.mrb[0].mxu0 %v285_v8  ;;  %1311 = vmatprep.subr.bf16.mxu0 %v1310_v47  ;;  %v308_v47 = vld [vmem:[%s1486_s14 + $0xb8] sm:$0xff]  ;;  %v351_v8 = vld [vmem:[%s1838_s2] sm:$0x3] }
  0x2b   : > { %1098 = vmatprep.mubr.msk.f32.mxu0 %vm363_vm0, %v288_v11  ;;  %1313 = vmatpush3.bf16.msra.mxu0 %v1312_v53  ;;  %v314_v53 = vld [vmem:[%s1486_s14 + $0xe8] sm:$0xff] }
  0x2c   : > { %1315 = vmatprep.subr.bf16.mxu0 %v1314_v56  ;;  %v315_v56 = vld [vmem:[%s1486_s14 + $0xf0] sm:$0xff]  ;;  %1372 = vmatpush3.bf16.msra.mxu1 %v1336_v59 }
  0x2e   : > { %483 = vmatmul.mubr.f32.gmra.mrb[2].mxu0 %v287_v15 }
  0x2f   : > { %1099 = vmatprep.mubr.msk.f32.mxu0 %vm363_vm0, %v290_v19  ;;  %1317 = vmatpush3.bf16.msra.mxu0 %v1316_v62  ;;  %v1338_v62 = vpack.c.bf16 %v636_v61, %v635_v60 }
  0x30   : > { %1319 = vmatprep.subr.bf16.mxu0 %v1318_v63  ;;  %v619_v63 = vld [vmem:[%s1839_s3 + $0x70] sm:$0xff] }
  0x31   : > { %v1340_v1 = vpack.c.bf16 %v620_v0, %v619_v63  ;;  %1365 = vmatprep.subr.bf16.mxu1 %v1338_v62 }
  0x32   : > { %489 = vmatmul.mubr.f32.gmra.mrb[4].mxu0 %v289_v23 }
  0x33   : > { %1100 = vmatprep.mubr.msk.f32.mxu0 %vm363_vm0, %v292_v27  ;;  %1321 = vmatpush3.bf16.msra.mxu0 %v1320_v5  ;;  %v353_v5 = vlaneseq }
  0x34   : > { %1323 = vmatprep.subr.bf16.mxu0 %v1322_v7  ;;  %1373 = vmatpush3.bf16.msra.mxu1 %v1340_v1 }
  0x35   : > { %1343 = vmatprep.subr.bf16.mxu1 %v1342_v4  ;;  %v354_v6 = vshrl.u32 %v353_v5, 7 }
  0x36   : > { %495 = vmatmul.mubr.f32.gmra.mrb[6].mxu0 %v291_v31 }
  0x37   : > { %1101 = vmatprep.mubr.msk.f32.mxu0 %vm363_vm0, %v294_v33  ;;  %1325 = vmatpush3.bf16.msra.mxu0 %v1324_v14  ;;  %v355_v7 = vsub.s32 0, %v354_v6  ;;  %v359_v9 = vsub.s32 1, %v354_v6 }
  0x38   : > { %1327 = vmatprep.subr.bf16.mxu0 %v1326_v16 }
  0x39   : > { %v1701_v10 = vrot.slane %v351_v8, %v355_v7  ;;  %v1703_v11 = vrot.slane %v351_v8, %v359_v9 }
  0x3a   : > { %501 = vmatmul.mubr.f32.gmra.mrb[8].mxu0 %v293_v34 }
  0x3b   : > { %1102 = vmatprep.mubr.msk.f32.mxu0 %vm363_vm0, %v296_v35  ;;  %1329 = vmatpush3.bf16.msra.mxu0 %v1328_v22 }
  0x3c   : > { %1331 = vmatprep.subr.bf16.mxu0 %v1330_v24 }
  0x3e   : > { %507 = vmatmul.mubr.f32.gmra.mrb[10].mxu0 %v295_v36 }
  0x3f   : > { %1103 = vmatprep.mubr.msk.f32.mxu0 %vm363_vm0, %v298_v37  ;;  %1333 = vmatpush3.bf16.msra.mxu0 %v1332_v30 }
  0x40   : > { %1335 = vmatprep.subr.bf16.mxu0 %v1334_v32 }
  0x42   : > { %513 = vmatmul.mubr.f32.gmra.mrb[12].mxu0 %v297_v38 }
  0x43   : > { %1104 = vmatprep.mubr.msk.f32.mxu0 %vm363_vm0, %v300_v39  ;;  %1337 = vmatpush3.bf16.msra.mxu0 %v1336_v59 }
  0x44   : > { %1339 = vmatprep.subr.bf16.mxu0 %v1338_v62 }
  0x46   : > { %519 = vmatmul.mubr.f32.gmra.mrb[14].mxu0 %v299_v40 }
  0x47   : > { %1105 = vmatprep.mubr.msk.f32.mxu0 %vm363_vm0, %v302_v41  ;;  %1341 = vmatpush3.bf16.msra.mxu0 %v1340_v1 }
  0x4a   : > { %525 = vmatmul.mubr.f32.gmra.mrb[16].mxu0 %v301_v42 }
  0x4b   : > { %1106 = vmatprep.mubr.msk.f32.mxu0 %vm363_vm0, %v304_v43 }
  0x4e   : > { %531 = vmatmul.mubr.f32.gmra.mrb[18].mxu0 %v303_v44 }
  0x4f   : > { %1107 = vmatprep.mubr.msk.f32.mxu0 %vm363_vm0, %v306_v45 }
  0x52   : > { %537 = vmatmul.mubr.f32.gmra.mrb[20].mxu0 %v305_v46 }
  0x53   : > { %1108 = vmatprep.mubr.msk.f32.mxu0 %vm363_vm0, %v308_v47 }
  0x56   : > { %543 = vmatmul.mubr.f32.gmra.mrb[22].mxu0 %v307_v48 }
  0x57   : > { %1109 = vmatprep.mubr.msk.f32.mxu0 %vm363_vm0, %v310_v49 }
  0x5a   : > { %549 = vmatmul.mubr.f32.gmra.mrb[24].mxu0 %v309_v50 }
  0x5b   : > { %1110 = vmatprep.mubr.msk.f32.mxu0 %vm363_vm0, %v312_v51 }
  0x5e   : > { %555 = vmatmul.mubr.f32.gmra.mrb[26].mxu0 %v311_v52 }
  0x5f   : > { %1111 = vmatprep.mubr.msk.f32.mxu0 %vm363_vm0, %v314_v53 }
  0x62   : > { %561 = vmatmul.mubr.f32.gmra.mrb[28].mxu0 %v313_v54 }
  0x63   : > { %1112 = vmatprep.mubr.msk.f32.mxu0 %vm363_vm0, %v316_v55 }
  0x66   : > { %567 = vmatmul.mubr.f32.gmra.mrb[30].mxu0 %v315_v56 }
  0xfd   : > { %v478_v12 = vpop.f32.mrb[0].mxu0 }
  0xfe   : > { %v479_v13 = vadd.f32 %v478_v12, %v1701_v10  ;;  %v480_v14 = vpop.f32.mrb[1].mxu0 }
  0xff   : > { %v481_v15 = vadd.f32 %v480_v14, %v1703_v11 }
 0x100   : > { %v573_v18 = vmax.f32 %v479_v13, 0.0 }
 0x101   : > { %v574_v16 = vmax.f32 %v481_v15, 0.0  ;;  %v484_v17 = vpop.f32.mrb[2].mxu0 }
 0x102   : > { %v485_v19 = vadd.f32 %v484_v17, %v1701_v10  ;;  %v486_v20 = vpop.f32.mrb[3].mxu0 }
 0x103   : > { %v487_v21 = vadd.f32 %v486_v20, %v1703_v11  ;;  %708 = vmatprep.mubr.f32.mxu0 %v574_v16 }
 0x104   : > { %709 = vmatmul.mubr.f32.vlgmr.msra.gmra.mrb[32].mxu0 %v573_v18  ;;  %v575_v24 = vmax.f32 %v485_v19, 0.0 }
 0x105   : > { %v576_v22 = vmax.f32 %v487_v21, 0.0  ;;  %v490_v23 = vpop.f32.mrb[4].mxu0 }
 0x106   : > { %v491_v25 = vadd.f32 %v490_v23, %v1701_v10  ;;  %v492_v26 = vpop.f32.mrb[5].mxu0 }
 0x107   : > { %v493_v27 = vadd.f32 %v492_v26, %v1703_v11  ;;  %713 = vmatprep.mubr.f32.mxu0 %v576_v22 }
 0x108   : > { %714 = vmatmul.mubr.f32.gmra.mrb[34].mxu0 %v575_v24  ;;  %v577_v30 = vmax.f32 %v491_v25, 0.0 }
 0x109   : > { %v578_v28 = vmax.f32 %v493_v27, 0.0  ;;  %v496_v29 = vpop.f32.mrb[6].mxu0 }
 0x10a   : > { %v497_v31 = vadd.f32 %v496_v29, %v1701_v10  ;;  %v498_v32 = vpop.f32.mrb[7].mxu0 }
 0x10b   : > { %718 = vmatprep.mubr.f32.mxu0 %v578_v28  ;;  %v499_v33 = vadd.f32 %v498_v32, %v1703_v11 }
 0x10c   : > { %719 = vmatmul.mubr.f32.gmra.mrb[36].mxu0 %v577_v30  ;;  %v579_v36 = vmax.f32 %v497_v31, 0.0 }
 0x10d   : > { %v502_v34 = vpop.f32.mrb[8].mxu0  ;;  %v580_v35 = vmax.f32 %v499_v33, 0.0 }
 0x10e   : > { %v503_v37 = vadd.f32 %v502_v34, %v1701_v10  ;;  %v504_v38 = vpop.f32.mrb[9].mxu0 }
 0x10f   : > { %v505_v39 = vadd.f32 %v504_v38, %v1703_v11  ;;  %723 = vmatprep.mubr.f32.mxu1 %v580_v35 }
 0x110   : > { %724 = vmatmul.mubr.f32.vlgmr.msra.gmra.mrb[0].mxu1 %v579_v36  ;;  %v581_v42 = vmax.f32 %v503_v37, 0.0 }
 0x111   : > { %v582_v40 = vmax.f32 %v505_v39, 0.0  ;;  %v508_v41 = vpop.f32.mrb[10].mxu0  ;;  %1345 = vmatpush3.bf16.msra.mxu1 %v1342_v4 }
 0x112   : > { %v509_v43 = vadd.f32 %v508_v41, %v1701_v10  ;;  %v510_v44 = vpop.f32.mrb[11].mxu0 }
 0x113   : > { %v511_v45 = vadd.f32 %v510_v44, %v1703_v11  ;;  %728 = vmatprep.mubr.f32.mxu1 %v582_v40 }
 0x114   : > { %729 = vmatmul.mubr.f32.gmra.mrb[2].mxu1 %v581_v42  ;;  %v583_v48 = vmax.f32 %v509_v43, 0.0 }
 0x115   : > { %v584_v46 = vmax.f32 %v511_v45, 0.0  ;;  %v514_v47 = vpop.f32.mrb[12].mxu0 }
 0x116   : > { %v515_v49 = vadd.f32 %v514_v47, %v1701_v10  ;;  %v516_v50 = vpop.f32.mrb[13].mxu0  ;;  %v808_v47 = vld [vmem:[%s1841_s5 + $0x18] sm:$0xff] }
 0x117   : > { %v517_v51 = vadd.f32 %v516_v50, %v1703_v11  ;;  %733 = vmatprep.mubr.f32.mxu1 %v584_v46  ;;  %v807_v46 = vld [vmem:[%s1841_s5 + $0x10] sm:$0xff] }
 0x118   : > { %734 = vmatmul.mubr.f32.gmra.mrb[4].mxu1 %v583_v48  ;;  %v585_v54 = vmax.f32 %v515_v49, 0.0  ;;  %v1346_v48 = vpack.c.bf16 %v808_v47, %v807_v46  ;;  %v811_v50 = vld [vmem:[%s1841_s5 + $0x30] sm:$0xff] }
 0x119   : > { %v586_v52 = vmax.f32 %v517_v51, 0.0  ;;  %v520_v53 = vpop.f32.mrb[14].mxu0  ;;  %v812_v51 = vld [vmem:[%s1841_s5 + $0x38] sm:$0xff] }
 0x11a   : > { %v521_v55 = vadd.f32 %v520_v53, %v1701_v10  ;;  %v522_v56 = vpop.f32.mrb[15].mxu0  ;;  %1347 = vmatprep.subr.bf16.mxu1 %v1346_v48 }
 0x11b   : > { %v523_v57 = vadd.f32 %v522_v56, %v1703_v11  ;;  %738 = vmatprep.mubr.f32.mxu1 %v586_v52  ;;  %1349 = vmatpush3.bf16.msra.mxu1 %v1346_v48  ;;  %v1354_v52 = vpack.c.bf16 %v812_v51, %v811_v50 }
 0x11c   : > { %739 = vmatmul.mubr.f32.gmra.mrb[6].mxu1 %v585_v54  ;;  %v587_v60 = vmax.f32 %v521_v55, 0.0  ;;  %v1758_v54 = vld [vmem:[%s1840_s4] ss:$0 sm:$0xff] }
 0x11d   : > { %v588_v58 = vmax.f32 %v523_v57, 0.0  ;;  %v526_v59 = vpop.f32.mrb[16].mxu0 }
 0x11e   : > { %v527_v61 = vadd.f32 %v526_v59, %v1701_v10  ;;  %v528_v62 = vpop.f32.mrb[17].mxu0 }
 0x11f   : > { %v529_v63 = vadd.f32 %v528_v62, %v1703_v11  ;;  %743 = vmatprep.mubr.f32.mxu1 %v588_v58 }
 0x120   : > { %744 = vmatmul.mubr.f32.gmra.mrb[8].mxu1 %v587_v60  ;;  %v589_v2 = vmax.f32 %v527_v61, 0.0 }
 0x121   : > { %v590_v0 = vmax.f32 %v529_v63, 0.0  ;;  %v532_v1 = vpop.f32.mrb[18].mxu0 }
 0x122   : > { %v533_v3 = vadd.f32 %v532_v1, %v1701_v10  ;;  %v534_v4 = vpop.f32.mrb[19].mxu0 }
 0x123   : > { %v535_v5 = vadd.f32 %v534_v4, %v1703_v11  ;;  %748 = vmatprep.mubr.f32.mxu1 %v590_v0 }
 0x124   : > { %749 = vmatmul.mubr.f32.gmra.mrb[10].mxu1 %v589_v2  ;;  %v591_v8 = vmax.f32 %v533_v3, 0.0 }
 0x125   : > { %v592_v6 = vmax.f32 %v535_v5, 0.0  ;;  %v538_v7 = vpop.f32.mrb[20].mxu0 }
 0x126   : > { %v539_v9 = vadd.f32 %v538_v7, %v1701_v10  ;;  %v540_v12 = vpop.f32.mrb[21].mxu0 }
 0x127   : > { %v541_v13 = vadd.f32 %v540_v12, %v1703_v11  ;;  %753 = vmatprep.mubr.f32.mxu1 %v592_v6 }
 0x128   : > { %754 = vmatmul.mubr.f32.gmra.mrb[12].mxu1 %v591_v8  ;;  %v593_v16 = vmax.f32 %v539_v9, 0.0 }
 0x129   : > { %v594_v14 = vmax.f32 %v541_v13, 0.0  ;;  %v544_v15 = vpop.f32.mrb[22].mxu0 }
 0x12a   : > { %v545_v17 = vadd.f32 %v544_v15, %v1701_v10  ;;  %v546_v18 = vpop.f32.mrb[23].mxu0 }
 0x12b   : > { %v547_v19 = vadd.f32 %v546_v18, %v1703_v11  ;;  %758 = vmatprep.mubr.f32.mxu1 %v594_v14 }
 0x12c   : > { %759 = vmatmul.mubr.f32.gmra.mrb[14].mxu1 %v593_v16  ;;  %v595_v22 = vmax.f32 %v545_v17, 0.0 }
 0x12d   : > { %v596_v20 = vmax.f32 %v547_v19, 0.0  ;;  %v550_v21 = vpop.f32.mrb[24].mxu0 }
 0x12e   : > { %v551_v23 = vadd.f32 %v550_v21, %v1701_v10  ;;  %v552_v24 = vpop.f32.mrb[25].mxu0 }
 0x12f   : > { %v553_v25 = vadd.f32 %v552_v24, %v1703_v11  ;;  %763 = vmatprep.mubr.f32.mxu1 %v596_v20 }
 0x130   : > { %764 = vmatmul.mubr.f32.gmra.mrb[16].mxu1 %v595_v22  ;;  %v597_v28 = vmax.f32 %v551_v23, 0.0 }
 0x131   : > { %v598_v26 = vmax.f32 %v553_v25, 0.0  ;;  %v556_v27 = vpop.f32.mrb[26].mxu0 }
 0x132   : > { %v557_v29 = vadd.f32 %v556_v27, %v1701_v10  ;;  %v558_v30 = vpop.f32.mrb[27].mxu0 }
 0x133   : > { %v559_v31 = vadd.f32 %v558_v30, %v1703_v11  ;;  %768 = vmatprep.mubr.f32.mxu1 %v598_v26 }
 0x134   : > { %769 = vmatmul.mubr.f32.gmra.mrb[18].mxu1 %v597_v28  ;;  %v599_v34 = vmax.f32 %v557_v29, 0.0 }
 0x135   : > { %v600_v32 = vmax.f32 %v559_v31, 0.0  ;;  %v562_v33 = vpop.f32.mrb[28].mxu0 }
 0x136   : > { %v563_v35 = vadd.f32 %v562_v33, %v1701_v10  ;;  %v564_v36 = vpop.f32.mrb[29].mxu0 }
 0x137   : > { %v565_v37 = vadd.f32 %v564_v36, %v1703_v11  ;;  %773 = vmatprep.mubr.f32.mxu1 %v600_v32 }
 0x138   : > { %774 = vmatmul.mubr.f32.gmra.mrb[20].mxu1 %v599_v34  ;;  %v601_v40 = vmax.f32 %v563_v35, 0.0 }
 0x139   : > { %v602_v38 = vmax.f32 %v565_v37, 0.0  ;;  %v568_v39 = vpop.f32.mrb[30].mxu0 }
 0x13a   : > { %v569_v41 = vadd.f32 %v568_v39, %v1701_v10  ;;  %v570_v42 = vpop.f32.mrb[31].mxu0  ;;  %v809_v10 = vld [vmem:[%s1841_s5 + $0x20] sm:$0xff] }
 0x13b   : > { %v571_v43 = vadd.f32 %v570_v42, %v1703_v11  ;;  %778 = vmatprep.mubr.f32.mxu1 %v602_v38  ;;  %v810_v11 = vld [vmem:[%s1841_s5 + $0x28] sm:$0xff] }
 0x13c   : > { %779 = vmatmul.mubr.f32.gmra.mrb[22].mxu1 %v601_v40  ;;  %v603_v45 = vmax.f32 %v569_v41, 0.0  ;;  %v1350_v49 = vpack.c.bf16 %v810_v11, %v809_v10 }
 0x13d   : > { %v604_v44 = vmax.f32 %v571_v43, 0.0 }
 0x13e   : > { %1351 = vmatprep.subr.bf16.mxu1 %v1350_v49 }
 0x13f   : > { %783 = vmatprep.mubr.f32.mxu1 %v604_v44  ;;  %1353 = vmatpush3.bf16.msra.mxu1 %v1350_v49 }
 0x140   : > { %784 = vmatmul.mubr.f32.gmra.mrb[24].mxu1 %v603_v45  ;;  %1355 = vmatprep.subr.bf16.mxu1 %v1354_v52 }
 0x143   : > { %1357 = vmatpush3.bf16.msra.mxu1 %v1354_v52 }
 0x1d7   : > { %v1166_v53 = vpop.f32.mrb[32].mxu0 }
 0x1d8   : > { %v1167_v55 = vpop.f32.mrb[33].mxu0 }
 0x1d9   : > { %v1168_v56 = vadd.f32 %v1167_v55, %v1166_v53 }
 0x1db   : > { %v711_v57 = vadd.f32 %v1168_v56, %v1758_v54  ;;  %v1169_v58 = vpop.f32.mrb[34].mxu0 }
 0x1dc   : > { %v1170_v59 = vpop.f32.mrb[35].mxu0 }
 0x1dd   : > { %v789_v60 = vmax.f32 %v711_v57, 0.0  ;;  %v1171_v61 = vadd.f32 %v1170_v59, %v1169_v58 }
 0x1df   : > { %v716_v62 = vadd.f32 %v1171_v61, %v1758_v54  ;;  %v1172_v63 = vpop.f32.mrb[36].mxu0  ;;  %1254 = vmatprep.mubr.msk.f32.mxu1 %vm820_vm1, %v789_v60 }
 0x1e0   : > { %v1173_v0 = vpop.f32.mrb[37].mxu0 }
 0x1e1   : > { %v790_v1 = vmax.f32 %v716_v62, 0.0  ;;  %v1174_v2 = vadd.f32 %v1173_v0, %v1172_v63 }
 0x1e3   : > { %v721_v3 = vadd.f32 %v1174_v2, %v1758_v54  ;;  %v1175_v4 = vpop.f32.mrb[0].mxu1  ;;  %1255 = vmatmul.mubr.msk.f32.vlgmr.msra.gmra.mrb[26].mxu1 %vm820_vm1, %v790_v1 }
 0x1e4   : > { %v1176_v5 = vpop.f32.mrb[1].mxu1 }
 0x1e5   : > { %v791_v6 = vmax.f32 %v721_v3, 0.0  ;;  %v1177_v7 = vadd.f32 %v1176_v5, %v1175_v4 }
 0x1e7   : > { %v726_v8 = vadd.f32 %v1177_v7, %v1758_v54  ;;  %v1178_v9 = vpop.f32.mrb[2].mxu1  ;;  %1257 = vmatprep.mubr.msk.f32.mxu1 %vm820_vm1, %v791_v6  ;;  %v1114_v7 = vld [vmem:[%s1842_s6] ss:$0 sm:$0xff] }
 0x1e8   : > { %v1179_v12 = vpop.f32.mrb[3].mxu1 }
 0x1e9   : > { %v792_v13 = vmax.f32 %v726_v8, 0.0  ;;  %v1180_v14 = vadd.f32 %v1179_v12, %v1178_v9 }
 0x1eb   : > { %v731_v15 = vadd.f32 %v1180_v14, %v1758_v54  ;;  %v1181_v16 = vpop.f32.mrb[4].mxu1  ;;  %1258 = vmatmul.mubr.msk.f32.gmra.mrb[28].mxu1 %vm820_vm1, %v792_v13 }
 0x1ec   : > { %v1182_v17 = vpop.f32.mrb[5].mxu1 }
 0x1ed   : > { %v793_v18 = vmax.f32 %v731_v15, 0.0  ;;  %v1183_v19 = vadd.f32 %v1182_v17, %v1181_v16 }
 0x1ef   : > { %v736_v20 = vadd.f32 %v1183_v19, %v1758_v54  ;;  %v1184_v21 = vpop.f32.mrb[6].mxu1  ;;  %1260 = vmatprep.mubr.msk.f32.mxu1 %vm820_vm1, %v793_v18 }
 0x1f0   : > { %v1185_v22 = vpop.f32.mrb[7].mxu1 }
 0x1f1   : > { %v794_v23 = vmax.f32 %v736_v20, 0.0  ;;  %v1186_v24 = vadd.f32 %v1185_v22, %v1184_v21 }
 0x1f3   : > { %v741_v25 = vadd.f32 %v1186_v24, %v1758_v54  ;;  %v1187_v26 = vpop.f32.mrb[8].mxu1  ;;  %1261 = vmatmul.mubr.msk.f32.gmra.mrb[30].mxu1 %vm820_vm1, %v794_v23 }
 0x1f4   : > { %v1188_v27 = vpop.f32.mrb[9].mxu1 }
 0x1f5   : > { %v795_v28 = vmax.f32 %v741_v25, 0.0  ;;  %v1189_v29 = vadd.f32 %v1188_v27, %v1187_v26 }
 0x1f7   : > { %v746_v30 = vadd.f32 %v1189_v29, %v1758_v54  ;;  %v1190_v31 = vpop.f32.mrb[10].mxu1  ;;  %1263 = vmatprep.mubr.msk.f32.mxu1 %vm820_vm1, %v795_v28 }
 0x1f8   : > { %v1191_v32 = vpop.f32.mrb[11].mxu1 }
 0x1f9   : > { %v796_v33 = vmax.f32 %v746_v30, 0.0  ;;  %v1192_v34 = vadd.f32 %v1191_v32, %v1190_v31 }
 0x1fb   : > { %v751_v35 = vadd.f32 %v1192_v34, %v1758_v54  ;;  %v1193_v36 = vpop.f32.mrb[12].mxu1  ;;  %1264 = vmatmul.mubr.msk.f32.gmra.mrb[32].mxu1 %vm820_vm1, %v796_v33 }
 0x1fc   : > { %v1194_v37 = vpop.f32.mrb[13].mxu1 }
 0x1fd   : > { %v797_v38 = vmax.f32 %v751_v35, 0.0  ;;  %v1195_v39 = vadd.f32 %v1194_v37, %v1193_v36 }
 0x1ff   : > { %v756_v40 = vadd.f32 %v1195_v39, %v1758_v54  ;;  %v1196_v41 = vpop.f32.mrb[14].mxu1  ;;  %1266 = vmatprep.mubr.msk.f32.mxu1 %vm820_vm1, %v797_v38 }
 0x200   : > { %v1197_v42 = vpop.f32.mrb[15].mxu1 }
 0x201   : > { %v798_v43 = vmax.f32 %v756_v40, 0.0  ;;  %v1198_v44 = vadd.f32 %v1197_v42, %v1196_v41 }
 0x203   : > { %v761_v45 = vadd.f32 %v1198_v44, %v1758_v54  ;;  %v1199_v46 = vpop.f32.mrb[16].mxu1  ;;  %1267 = vmatmul.mubr.msk.f32.gmra.mrb[34].mxu1 %vm820_vm1, %v798_v43 }
 0x204   : > { %v1200_v47 = vpop.f32.mrb[17].mxu1 }
 0x205   : > { %v799_v48 = vmax.f32 %v761_v45, 0.0  ;;  %v1201_v10 = vadd.f32 %v1200_v47, %v1199_v46 }
 0x207   : > { %v766_v11 = vadd.f32 %v1201_v10, %v1758_v54  ;;  %v1202_v49 = vpop.f32.mrb[18].mxu1  ;;  %1269 = vmatprep.mubr.msk.f32.mxu1 %vm820_vm1, %v799_v48 }
 0x208   : > { %v1203_v50 = vpop.f32.mrb[19].mxu1 }
 0x209   : > { %v800_v51 = vmax.f32 %v766_v11, 0.0  ;;  %v1204_v52 = vadd.f32 %v1203_v50, %v1202_v49 }
 0x20b   : > { %v771_v53 = vadd.f32 %v1204_v52, %v1758_v54  ;;  %v1205_v55 = vpop.f32.mrb[20].mxu1  ;;  %1270 = vmatmul.mubr.msk.f32.gmra.mrb[36].mxu1 %vm820_vm1, %v800_v51 }
 0x20c   : > { %v1206_v56 = vpop.f32.mrb[21].mxu1 }
 0x20d   : > { %v801_v57 = vmax.f32 %v771_v53, 0.0  ;;  %v1207_v58 = vadd.f32 %v1206_v56, %v1205_v55 }
 0x20f   : > { %v776_v59 = vadd.f32 %v1207_v58, %v1758_v54  ;;  %v1208_v60 = vpop.f32.mrb[22].mxu1  ;;  %1272 = vmatprep.mubr.msk.f32.mxu1 %vm820_vm1, %v801_v57 }
 0x210   : > { %v1209_v61 = vpop.f32.mrb[23].mxu1 }
 0x211   : > { %v802_v62 = vmax.f32 %v776_v59, 0.0  ;;  %v1210_v63 = vadd.f32 %v1209_v61, %v1208_v60 }
 0x213   : > { %v781_v0 = vadd.f32 %v1210_v63, %v1758_v54  ;;  %v1211_v1 = vpop.f32.mrb[24].mxu1  ;;  %1273 = vmatmul.mubr.msk.f32.gmra.mrb[38].mxu1 %vm820_vm1, %v802_v62 }
 0x214   : > { %v1212_v2 = vpop.f32.mrb[25].mxu1 }
 0x215   : > { %v803_v3 = vmax.f32 %v781_v0, 0.0  ;;  %v1213_v4 = vadd.f32 %v1212_v2, %v1211_v1 }
 0x217   : > { %v786_v5 = vadd.f32 %v1213_v4, %v1758_v54  ;;  %1275 = vmatprep.mubr.msk.f32.mxu1 %vm820_vm1, %v803_v3 }
 0x219   : > { %v804_v6 = vmax.f32 %v786_v5, 0.0 }
 0x21b   : > { %1276 = vmatmul.mubr.msk.f32.gmra.mrb[40].mxu1 %vm820_vm1, %v804_v6 }
 0x2b6   : > { %v1256_v54 = vpop.f32.mrb[26].mxu1 }
 0x2b7   : > { %v941_v8 = vadd.f32 %v1256_v54, %v1114_v7  ;;  %v935_v9 = vpop.f32.mrb[27].mxu1 }
 0x2b8   : > { %v936_v12 = vadd.f32 %v1114_v7, %v935_v9 }
 0x2b9   : > { %1016 = vst.msk [vmem:[%s1799_s22 + $0x8] sm:$0xff] %vm1014_vm2, %v941_v8 }
 0x2ba   : > { %1015 = vst.msk [vmem:[%s1799_s22] sm:$0xff] %vm1014_vm2, %v936_v12 }
 0x2be   : > { %v1259_v13 = vpop.f32.mrb[28].mxu1 }
 0x2bf   : > { %v951_v14 = vadd.f32 %v1259_v13, %v1114_v7  ;;  %v945_v15 = vpop.f32.mrb[29].mxu1 }
 0x2c0   : > { %v946_v16 = vadd.f32 %v1114_v7, %v945_v15 }
 0x2c1   : > { %1018 = vst.msk [vmem:[%s1799_s22 + $0x18] sm:$0xff] %vm1014_vm2, %v951_v14 }
 0x2c2   : > { %1017 = vst.msk [vmem:[%s1799_s22 + $0x10] sm:$0xff] %vm1014_vm2, %v946_v16 }
 0x2c6   : > { %v1262_v17 = vpop.f32.mrb[30].mxu1 }
 0x2c7   : > { %v961_v18 = vadd.f32 %v1262_v17, %v1114_v7  ;;  %v955_v19 = vpop.f32.mrb[31].mxu1 }
 0x2c8   : > { %v956_v20 = vadd.f32 %v1114_v7, %v955_v19 }
 0x2c9   : > { %1020 = vst.msk [vmem:[%s1799_s22 + $0x28] sm:$0xff] %vm1014_vm2, %v961_v18 }
 0x2ca   : > { %1019 = vst.msk [vmem:[%s1799_s22 + $0x20] sm:$0xff] %vm1014_vm2, %v956_v20 }
 0x2ce   : > { %v1265_v21 = vpop.f32.mrb[32].mxu1 }
 0x2cf   : > { %v971_v22 = vadd.f32 %v1265_v21, %v1114_v7  ;;  %v965_v23 = vpop.f32.mrb[33].mxu1 }
 0x2d0   : > { %v966_v24 = vadd.f32 %v1114_v7, %v965_v23 }
 0x2d1   : > { %1022 = vst.msk [vmem:[%s1799_s22 + $0x38] sm:$0xff] %vm1014_vm2, %v971_v22 }
 0x2d2   : > { %1021 = vst.msk [vmem:[%s1799_s22 + $0x30] sm:$0xff] %vm1014_vm2, %v966_v24 }
 0x2d6   : > { %v1268_v25 = vpop.f32.mrb[34].mxu1 }
 0x2d7   : > { %v981_v26 = vadd.f32 %v1268_v25, %v1114_v7  ;;  %v975_v27 = vpop.f32.mrb[35].mxu1 }
 0x2d8   : > { %v976_v28 = vadd.f32 %v1114_v7, %v975_v27 }
 0x2d9   : > { %1024 = vst.msk [vmem:[%s1799_s22 + $0x48] sm:$0xff] %vm1014_vm2, %v981_v26 }
 0x2da   : > { %1023 = vst.msk [vmem:[%s1799_s22 + $0x40] sm:$0xff] %vm1014_vm2, %v976_v28 }
 0x2de   : > { %v1271_v29 = vpop.f32.mrb[36].mxu1 }
 0x2df   : > { %v991_v30 = vadd.f32 %v1271_v29, %v1114_v7  ;;  %v985_v31 = vpop.f32.mrb[37].mxu1 }
 0x2e0   : > { %v986_v32 = vadd.f32 %v1114_v7, %v985_v31 }
 0x2e1   : > { %1026 = vst.msk [vmem:[%s1799_s22 + $0x58] sm:$0xff] %vm1014_vm2, %v991_v30 }
 0x2e2   : > { %1025 = vst.msk [vmem:[%s1799_s22 + $0x50] sm:$0xff] %vm1014_vm2, %v986_v32 }
 0x2e6   : > { %v1274_v33 = vpop.f32.mrb[38].mxu1 }
 0x2e7   : > { %v1001_v34 = vadd.f32 %v1274_v33, %v1114_v7  ;;  %v995_v35 = vpop.f32.mrb[39].mxu1 }
 0x2e8   : > { %v996_v36 = vadd.f32 %v1114_v7, %v995_v35 }
 0x2e9   : > { %1028 = vst.msk [vmem:[%s1799_s22 + $0x68] sm:$0xff] %vm1014_vm2, %v1001_v34 }
 0x2ea   : > { %1027 = vst.msk [vmem:[%s1799_s22 + $0x60] sm:$0xff] %vm1014_vm2, %v996_v36 }
 0x2ee   : > { %v1277_v37 = vpop.f32.mrb[40].mxu1 }
 0x2ef   : > { %v1011_v38 = vadd.f32 %v1277_v37, %v1114_v7  ;;  %v1005_v39 = vpop.f32.mrb[41].mxu1 }
 0x2f0   : > { %v1006_v40 = vadd.f32 %v1114_v7, %v1005_v39 }
 0x2f1   : > { %1030 = vst.msk [vmem:[%s1799_s22 + $0x78] sm:$0xff] %vm1014_vm2, %v1011_v38 }
 0x2f2   : > { %1029 = vst.msk [vmem:[%s1799_s22 + $0x70] sm:$0xff] %vm1014_vm2, %v1006_v40 }
 0x2f3 PF: > { %s17_s24 = sadd.s32 1, %s1388_s24  }
 0x2f4   : > { %p14_p4 = scmp.ge.s32.totalorder %s17_s24, 5  }
 0x2f6   :  { %16 = sbr.rel (!%p14_p4) target bundleno = 1 (0x1), region = 78 }

</bundles_post_ra>
